<compile_context>
chip_gen: v7x
topology: tpu7x:2x2x1
jax: 0.10.0
libtpu: 0.0.40
codegen_flags: <defaults>
</compile_context>

<pallas_src>
import functools

import jax
import jax.numpy as jnp
from jax.experimental import pallas as pl
from jax.experimental.pallas import tpu as pltpu


def _round_up(a, b):
    return ((a + b - 1) // b) * b


def _cdiv(a, b):
    return (a + b - 1) // b


def _scale_kernel(x_ref, w_ref, o_ref, *, tr):
    # x_ref / o_ref: (tr, tc) tile of the input/output slab.
    # w_ref: (rows_pad, 1) full per-row scale, resident in VMEM (constant
    # block index -> fetched once, not per grid step).
    r0 = pl.multiple_of(pl.program_id(0) * tr, tr)
    w = w_ref[pl.ds(r0, tr), :]          # (tr, 1), broadcasts over lanes
    o_ref[...] = x_ref[...] * w


def scale_module_forward(x, weight, *, target_block_bytes=2 * 1024 * 1024):
    """out = weight * x, weight shape (1, C, 1, 1) broadcasting over NCHW x."""
    N, C, H, W = x.shape
    dtype = x.dtype
    itemsize = jnp.dtype(dtype).itemsize

    rows = N * C
    cols = H * W

    LANE = 128
    # Sub-32-bit dtypes pack along sublanes: f32 -> 8, bf16/f16 -> 16, i8/fp8 -> 32.
    sub = max(8, 32 // itemsize)

    cols_p = _round_up(cols, LANE)

    # Column tile: multiple of 128, balanced across col blocks so padding stays
    # small, capped so a single (sub, tc) stripe fits the block budget.
    max_tc = max(LANE, (target_block_bytes // (sub * itemsize)) // LANE * LANE)
    nc = _cdiv(cols_p, max_tc)
    tc = _round_up(_cdiv(cols_p, nc), LANE)
    cols_pad = nc * tc

    # Row tile: fill the ~2 MiB block budget, multiple of `sub`, balanced.
    rows_min = _round_up(rows, sub)
    max_tr = max(sub, (target_block_bytes // (tc * itemsize)) // sub * sub)
    nr = _cdiv(rows_min, max_tr)
    tr = _round_up(_cdiv(rows_min, nr), sub)
    rows_pad = nr * tr

    # Plain-JAX glue: lane-dense slab + per-row scale (channel scale over batch).
    x2d = x.reshape(rows, cols)
    if rows_pad != rows or cols_pad != cols:
        x2d = jnp.pad(x2d, ((0, rows_pad - rows), (0, cols_pad - cols)))

    w_rows = jnp.broadcast_to(
        weight.reshape(1, C).astype(dtype), (N, C)
    ).reshape(rows, 1)
    if rows_pad != rows:
        w_rows = jnp.pad(w_rows, ((0, rows_pad - rows), (0, 0)))

    kernel = functools.partial(_scale_kernel, tr=tr)

    out2d = pl.pallas_call(
        kernel,
        out_shape=jax.ShapeDtypeStruct((rows_pad, cols_pad), dtype),
        grid_spec=pltpu.PrefetchScalarGridSpec(
            num_scalar_prefetch=0,
            grid=(nr, nc),
            in_specs=[
                pl.BlockSpec((tr, tc), lambda r, c: (r, c)),
                # Full weight vector, constant block index -> VMEM-resident.
                pl.BlockSpec((rows_pad, 1), lambda r, c: (0, 0)),
            ],
            out_specs=pl.BlockSpec((tr, tc), lambda r, c: (r, c)),
        ),
        compiler_params=pltpu.CompilerParams(
            dimension_semantics=("parallel", "parallel"),
            # ~2 MiB x/out blocks, double-buffered -> ~8-9 MiB resident.
            # Explicit 32 MiB: raises v5e's 16 MiB scoped default, stays well
            # inside v7x's 64 MiB physical VMEM.
            vmem_limit_bytes=32 * 1024 * 1024,
        ),
    )(x2d, w_rows)

    if rows_pad != rows or cols_pad != cols:
        out2d = out2d[:rows, :cols]
    return out2d.reshape(N, C, H, W)


if __name__ == "__main__":
    key = jax.random.PRNGKey(0)
    N, C, H, W = 2, 4, 16, 16

    x = jax.random.normal(key, (N, C, H, W), dtype=jnp.float32)

    # nn.Parameter(torch.ones(*dims) * init_scale), dims = (1, C, 1, 1)
    dims = (1, C, 1, 1)
    init_scale = 1.0
    weight = jnp.ones(dims, dtype=jnp.float32) * init_scale
    # Perturb deterministically so the multiply is non-trivial to check.
    weight = weight * (1.0 + 0.1 * jnp.arange(C, dtype=jnp.float32).reshape(1, C, 1, 1))

    out = scale_module_forward(x, weight)
    out = jax.block_until_ready(out)

    ref = weight * x  # broadcasting reference
    assert out.shape == x.shape
    assert jnp.allclose(out, ref, atol=1e-6, rtol=1e-6)

    print("KERNEL_OK")
</pallas_src>

<mosaic_0001>
module attributes {stable_mosaic.version = 11 : i64} {
  func.func @_scale_kernel(%arg0: i32, %arg1: i32, %arg2: memref<8x256xf32, #tpu.memory_space<vmem>>, %arg3: memref<8x1xf32, #tpu.memory_space<vmem>>, %arg4: memref<8x256xf32, #tpu.memory_space<vmem>>) attributes {dimension_semantics = [#tpu.dimension_semantics<parallel>, #tpu.dimension_semantics<parallel>], iteration_bounds = array<i64: 1, 1>, scalar_prefetch = 0 : i64, scratch_operands = 0 : i64, tpu.core_type = #tpu.core_type<tc>, window_params = [{transform_indices = @transform_0, window_bounds = array<i64: 8, 256>}, {pipeline_mode = #tpu.pipeline_mode<synchronous>, transform_indices = @transform_1, window_bounds = array<i64: 8, 1>}, {transform_indices = @transform_2, window_bounds = array<i64: 8, 256>}]} {
    %c8_i32 = arith.constant 8 : i32
    %0 = arith.muli %arg0, %c8_i32 : i32
    %1 = tpu.assume_multiple %0, 8 : i32
    %2 = arith.index_cast %1 : i32 to index
    %c0 = arith.constant 0 : index
    %3 = vector.load %arg3[%2, %c0] : memref<8x1xf32, #tpu.memory_space<vmem>>, vector<8x1xf32>
    %c0_0 = arith.constant 0 : index
    %c0_1 = arith.constant 0 : index
    %4 = vector.load %arg2[%c0_0, %c0_1] : memref<8x256xf32, #tpu.memory_space<vmem>>, vector<8x256xf32>
    %5 = vector.broadcast %3 : vector<8x1xf32> to vector<8x256xf32>
    %6 = arith.mulf %4, %5 : vector<8x256xf32>
    %c0_2 = arith.constant 0 : index
    %c0_3 = arith.constant 0 : index
    %7 = vector.load %arg4[%c0_2, %c0_3] : memref<8x256xf32, #tpu.memory_space<vmem>>, vector<8x256xf32>
    tpu.vector_store %arg4[%c0_2, %c0_3], %6 {strides = array<i32>} : memref<8x256xf32, #tpu.memory_space<vmem>>, vector<8x256xf32>,
    return
  }
  func.func @transform_0(%arg0: i32, %arg1: i32) -> (i32, i32) {
    %c0_i32 = arith.constant 0 : i32
    return %arg0, %arg1 : i32, i32
  }
  func.func @transform_1(%arg0: i32, %arg1: i32) -> (i32, i32) {
    %c0_i32 = arith.constant 0 : i32
    %c0_i32_0 = arith.constant 0 : i32
    %c0_i32_1 = arith.constant 0 : i32
    return %c0_i32, %c0_i32_0 : i32, i32
  }
  func.func @transform_2(%arg0: i32, %arg1: i32) -> (i32, i32) {
    %c0_i32 = arith.constant 0 : i32
    return %arg0, %arg1 : i32, i32
  }
}

</mosaic_0001>

<bundles_post_ra>
// kernel: tpu_custom_call.1
= control target key start
LH: loop header
LB: loop body
LE: loop exit
PB: predicated region body
PF: predicated region fallthrough
CT: control target
= control target key end

     0   :  { %7 = vsyncpa [#allocation3], 0  ;;  %s150_s0 = inlined_call_operand.hbm [shape: f32[8,256], index: 0, kind: input, shape index: {}]   ;;  %s151_s1 = inlined_call_operand.vmem [shape: f32[8,1], index: 1, kind: input, shape index: {}]   ;;  %s152_s2 = inlined_call_operand.hbm [shape: f32[8,256], index: 2, kind: output, shape index: {}]  }
   0x1   :  { %8 = vsyncpa [#allocation4], 0  ;;  %s105_s9 = smov [#allocation2]   ;;  %s57_s13 = scalar_lea.hbm %s150_s0, 256 }
   0x2   :  { %s15_s10 = sshll.u32 %s105_s9, 4  ;;  %p58_p0 = scmp.ne.s32.totalorder %s150_s0, %s57_s13  ;;  %s16_s10 = int_to_ptr.vmem [resolvable:$true] %s15_s10 }
   0x3   :  { %p61_p1 = scmp.lt.u32.totalorder %s57_s13, %s150_s0 }
   0x5   :  { %p63_p2 = pnand %p61_p1, %p58_p0 }
   0x7   :  { %66 = shalt.err (!%p63_p2)
}
   0x8   :  { %s67_s18 = scalar_lea.vmem %s16_s10, 256  ;;  %p72_p4 = scmp.lt.s32.totalorder %s16_s10, %s16_s10 }
   0x9   :  { %p68_p3 = scmp.ne.s32.totalorder %s16_s10, %s67_s18  ;;  %p73_p5 = scmp.lt.s32.totalorder %s67_s18, %s67_s18 }
   0xb   :  { %p74_p6 = por %p73_p5, %p72_p4 }
   0xd   :  { %p75_p7 = pnand %p74_p6, %p68_p3 }
   0xf   :  { %78 = shalt.err (!%p75_p7)
}
  0x10   :  { %18 = dma.hbm_to_vmem [thread:$0]  %s150_s0, 256, %s16_s10, [#allocation3]  }
  0x11   :  { %101 = dma.done.wait [#allocation3], 256  }
  0x12   :  { %102 = vsyncadd [#allocation3], 4294967040  ;;  %v106_v0 = vmov 0   ;;  %v26_v1 = vld [vmem:[%s151_s1] sm:$0xff]  ;;  %v28_v3 = vld [vmem:[#allocation2 + $0x8] sm:$0xff]  ;;  %s107_s23 = smov [#allocation5]  }
  0x13   :  { %56 = vset.pattern.permute.xlu0 %v106_v0  ;;  %v27_v2 = vld [vmem:[#allocation2] sm:$0xff]  ;;  %s44_s24 = sshll.u32 %s107_s23, 4  ;;  %s45_s24 = int_to_ptr.vmem [resolvable:$true] %s44_s24 }
  0x14   :  { %31 = vperm.xlu0 %56, %v26_v1   ;;  %s79_s0 = scalar_lea.vmem %s45_s24, 256  ;;  %p84_p9 = scmp.lt.s32.totalorder %s45_s24, %s45_s24 }
  0x15   :  { %p80_p8 = scmp.ne.s32.totalorder %s45_s24, %s79_s0  ;;  %p85_p10 = scmp.lt.s32.totalorder %s79_s0, %s79_s0 }
  0x17   :  { %p86_p11 = por %p85_p10, %p84_p9 }
  0x19   :  { %p87_p12 = pnand %p86_p11, %p80_p8 }
  0x93   :  { %v32_v4 = vpop.permute.xlu0 %31 }
  0x94   :  { %v34_v5 = vmul.f32 %v32_v4, %v27_v2  ;;  %v35_v6 = vmul.f32 %v32_v4, %v28_v3 }
  0x96   :  { %36 = vst [vmem:[#allocation5] sm:$0xff] %v34_v5  ;;  %37 = vst [vmem:[#allocation5 + $0x8] sm:$0xff] %v35_v6 }
  0x97   :  { %90 = shalt.err (!%p87_p12)
}
  0x98   :  { %s91_s26 = scalar_lea.hbm %s152_s2, 256 }
  0x99   :  { %p92_p13 = scmp.ne.s32.totalorder %s152_s2, %s91_s26  ;;  %p95_p0 = scmp.lt.u32.totalorder %s91_s26, %s152_s2 }
  0x9b   :  { %p97_p1 = pnand %p95_p0, %p92_p13 }
  0x9d   :  { %100 = shalt.err (!%p97_p1)
}
  0x9e   :  { %47 = dma.vmem_to_hbm [thread:$0]  %s45_s24, 256, %s152_s2, [#allocation4]  }
  0x9f   :  { %103 = dma.done.wait [#allocation4], 256  }
  0xa0   :  { %104 = vsyncadd [#allocation4], 4294967040 }
  0xa1   :  { %51 = vsyncpa [#allocation3], 1 }
  0xa2   :  { %52 = vsyncpa [#allocation4], 1 }

</bundles_post_ra>
